<compile_context>
chip_gen: v7x
topology: tpu7x:2x2x1
jax: 0.10.0
libtpu: 0.0.40
codegen_flags: <defaults>
</compile_context>

<pallas_src>
import jax
import jax.numpy as jnp
from jax.experimental import pallas as pl
from jax.experimental.pallas import tpu as pltpu

H = 64  # hidden dim, kept at its natural size (no zero-padded rows)
K = 4   # input features (CartPole state dim, fixed by the module)


def value_net_kernel(x_ref, w1_ref, b1_ref, w2_ref, b2_ref, o_ref):
    # x_ref : [4, TB]   (features on sublanes, batch on lanes)
    # w1_ref: [64, 4]   (PyTorch linear1.weight, VMEM-resident)
    # b1_ref: [64, 1]
    # w2_ref: [64, 1]   (linear2.weight transposed)
    # b2_ref: [1, 1]
    # o_ref : [1, TB]
    x = x_ref[...]
    w1 = w1_ref[...]

    # Layer 1: K=4 -> four unrolled broadcast multiply-accumulates on the VPU.
    # (MXU offload is the next candidate once the pop path is bundle-verified.)
    h = b1_ref[...] + w1[:, 0:1] * x[0:1, :]
    h = h + w1[:, 1:2] * x[1:2, :]
    h = h + w1[:, 2:3] * x[2:3, :]
    h = h + w1[:, 3:4] * x[3:4, :]
    h = jnp.maximum(h, 0.0)                                   # ReLU, [H, TB]

    # Layer 2: N=1 -> VPU multiply + reduction over the hidden (sublane) axis.
    v = jnp.sum(h * w2_ref[...], axis=0, keepdims=True) + b2_ref[...]   # [1, TB]
    o_ref[...] = v.astype(o_ref.dtype)


def _round_up(n, m):
    return ((n + m - 1) // m) * m


def _choose_batch_tile(B, tb_max=8192):
    """Pick the batch tile TB (a multiple of 128).

    Goals: big tiles to amortize the ~0.35us/step pipeline overhead, batch
    padding waste <= ~10% (the kernel is compute-bound, padded lanes are real
    VPU time), and >= 2 grid steps when B allows so both v7x TensorCores work.
    """
    B128 = _round_up(B, 128)
    tb_max = max(128, min(tb_max, B128))
    if B128 == 128:
        return 128

    def cost(tb):
        b_pad = _round_up(B, tb)
        grid = b_pad // tb
        pad_frac = (b_pad - B) / b_pad
        # hard-penalize >10% padding, then 1-step grids (idle 2nd TC on v7x),
        # then prefer fewer steps (less per-step overhead), then less padding.
        return (pad_frac > 0.10, grid < 2, grid, pad_frac)

    return min(range(128, tb_max + 1, 128), key=cost)


def prepare_params(w1, b1, w2, b2):
    """One-time repack of PyTorch-layout params into kernel layout.

    Hoisted out of the forward path; with H kept at 64 no zero-padding is
    needed, only reshapes/transposes.
    """
    w1p = jnp.asarray(w1, jnp.float32)                  # [64, 4]
    b1p = jnp.asarray(b1, jnp.float32).reshape(H, 1)    # [64, 1]
    w2p = jnp.asarray(w2, jnp.float32).T                # [64, 1]
    b2p = jnp.asarray(b2, jnp.float32).reshape(1, 1)    # [1, 1]
    return w1p, b1p, w2p, b2p


def value_net_forward_prepared(x, params, *, tb_max=8192):
    """ValueNet forward with pre-packed params.  x: [B, 4] f32 -> [B, 1] f32."""
    w1p, b1p, w2p, b2p = params
    B = x.shape[0]
    TB = _choose_batch_tile(B, tb_max)
    B_pad = _round_up(B, TB)

    # Transposed, lane-dense activations: batch on the 128-lane axis.
    xT = jnp.zeros((K, B_pad), jnp.float32).at[:, :B].set(x.T.astype(jnp.float32))

    vT = pl.pallas_call(
        value_net_kernel,
        out_shape=jax.ShapeDtypeStruct((1, B_pad), jnp.float32),
        grid_spec=pltpu.PrefetchScalarGridSpec(
            num_scalar_prefetch=0,
            grid=(B_pad // TB,),
            in_specs=[
                pl.BlockSpec((K, TB), lambda i: (0, i)),     # x tile (streamed)
                pl.BlockSpec((H, K), lambda i: (0, 0)),      # weights: VMEM-resident
                pl.BlockSpec((H, 1), lambda i: (0, 0)),
                pl.BlockSpec((H, 1), lambda i: (0, 0)),
                pl.BlockSpec((1, 1), lambda i: (0, 0)),
            ],
            out_specs=pl.BlockSpec((1, TB), lambda i: (0, i)),  # lane-dense output
        ),
        compiler_params=pltpu.CompilerParams(
            dimension_semantics=("parallel",),   # megacore sharding on v7x
        ),
    )(xT, w1p, b1p, w2p, b2p)

    # Padded lanes (columns >= B) hold relu(b1)·w2 + b2 garbage -- always slice
    # before any downstream reduction.  Return PyTorch-style [B, 1].
    return vT[0, :B].reshape(B, 1)


def value_net_forward(x, w1, b1, w2, b2, *, tb_max=8192):
    """Convenience wrapper taking raw PyTorch-layout params (repacks per call)."""
    return value_net_forward_prepared(x, prepare_params(w1, b1, w2, b2), tb_max=tb_max)


def init_params(key):
    """Deterministic init with PyTorch nn.Linear layouts.

    linear1.weight [64, 4], linear1.bias [64],
    linear2.weight [1, 64], linear2.bias [1].
    """
    k1, k2, k3, k4 = jax.random.split(key, 4)
    bound1 = 1.0 / jnp.sqrt(4.0)   # fan_in = 4
    bound2 = 1.0 / jnp.sqrt(64.0)  # fan_in = 64
    w1 = jax.random.uniform(k1, (64, 4), jnp.float32, -bound1, bound1)
    b1 = jax.random.uniform(k2, (64,), jnp.float32, -bound1, bound1)
    w2 = jax.random.uniform(k3, (1, 64), jnp.float32, -bound2, bound2)
    b2 = jax.random.uniform(k4, (1,), jnp.float32, -bound2, bound2)
    return w1, b1, w2, b2


if __name__ == "__main__":
    key = jax.random.PRNGKey(0)
    k_x, k_p = jax.random.split(key)

    # Small CartPole-style batch; state dim fixed at 4 by the module.
    B = 8
    x = jax.random.normal(k_x, (B, 4), jnp.float32)
    w1, b1, w2, b2 = init_params(k_p)

    params = prepare_params(w1, b1, w2, b2)        # one-time param repack
    value = value_net_forward_prepared(x, params)
    value = jax.block_until_ready(value)

    # Reference check against plain JAX (same math as the PyTorch forward).
    hi = jax.lax.Precision.HIGHEST
    ref = jnp.dot(jnp.maximum(jnp.dot(x, w1.T, precision=hi) + b1, 0.0),
                  w2.T, precision=hi) + b2
    assert value.shape == (B, 1)
    assert jnp.allclose(value, ref, atol=1e-4, rtol=1e-4)

    # TODO(synk): optimizer (Adam) in __init__ is training-only state; not part of forward.
    print("KERNEL_OK")
</pallas_src>

<mosaic_0001>
module attributes {stable_mosaic.version = 11 : i64} {
  func.func @value_net_kernel(%arg0: i32, %arg1: memref<4x128xf32, #tpu.memory_space<vmem>>, %arg2: memref<64x4xf32, #tpu.memory_space<vmem>>, %arg3: memref<64x1xf32, #tpu.memory_space<vmem>>, %arg4: memref<64x1xf32, #tpu.memory_space<vmem>>, %arg5: memref<1x1xf32, #tpu.memory_space<vmem>>, %arg6: memref<1x128xf32, #tpu.memory_space<vmem>>) attributes {dimension_semantics = [#tpu.dimension_semantics<parallel>], iteration_bounds = array<i64: 1>, scalar_prefetch = 0 : i64, scratch_operands = 0 : i64, tpu.core_type = #tpu.core_type<tc>, window_params = [{transform_indices = @transform_0, window_bounds = array<i64: 4, 128>}, {pipeline_mode = #tpu.pipeline_mode<synchronous>, transform_indices = @transform_1, window_bounds = array<i64: 64, 4>}, {pipeline_mode = #tpu.pipeline_mode<synchronous>, transform_indices = @transform_2, window_bounds = array<i64: 64, 1>}, {pipeline_mode = #tpu.pipeline_mode<synchronous>, transform_indices = @transform_3, window_bounds = array<i64: 64, 1>}, {pipeline_mode = #tpu.pipeline_mode<synchronous>, transform_indices = @transform_4, window_bounds = array<i64: 1, 1>}, {transform_indices = @transform_5, window_bounds = array<i64: 1, 128>}]} {
    %c0 = arith.constant 0 : index
    %c0_0 = arith.constant 0 : index
    %0 = vector.load %arg1[%c0, %c0_0] : memref<4x128xf32, #tpu.memory_space<vmem>>, vector<4x128xf32>
    %c0_1 = arith.constant 0 : index
    %c0_2 = arith.constant 0 : index
    %1 = vector.load %arg2[%c0_1, %c0_2] : memref<64x4xf32, #tpu.memory_space<vmem>>, vector<64x4xf32>
    %c0_3 = arith.constant 0 : index
    %c0_4 = arith.constant 0 : index
    %2 = vector.load %arg3[%c0_3, %c0_4] : memref<64x1xf32, #tpu.memory_space<vmem>>, vector<64x1xf32>
    %3 = vector.extract_strided_slice %1 {offsets = [0, 0], sizes = [64, 1], strides = [1, 1]} : vector<64x4xf32> to vector<64x1xf32>
    %4 = vector.extract_strided_slice %0 {offsets = [0, 0], sizes = [1, 128], strides = [1, 1]} : vector<4x128xf32> to vector<1x128xf32>
    %5 = vector.broadcast %3 : vector<64x1xf32> to vector<64x128xf32>
    %6 = vector.broadcast %4 : vector<1x128xf32> to vector<64x128xf32>
    %7 = arith.mulf %5, %6 : vector<64x128xf32>
    %8 = vector.broadcast %2 : vector<64x1xf32> to vector<64x128xf32>
    %9 = arith.addf %8, %7 : vector<64x128xf32>
    %10 = vector.extract_strided_slice %1 {offsets = [0, 1], sizes = [64, 1], strides = [1, 1]} : vector<64x4xf32> to vector<64x1xf32>
    %11 = vector.extract_strided_slice %0 {offsets = [1, 0], sizes = [1, 128], strides = [1, 1]} : vector<4x128xf32> to vector<1x128xf32>
    %12 = vector.broadcast %10 : vector<64x1xf32> to vector<64x128xf32>
    %13 = vector.broadcast %11 : vector<1x128xf32> to vector<64x128xf32>
    %14 = arith.mulf %12, %13 : vector<64x128xf32>
    %15 = arith.addf %9, %14 : vector<64x128xf32>
    %16 = vector.extract_strided_slice %1 {offsets = [0, 2], sizes = [64, 1], strides = [1, 1]} : vector<64x4xf32> to vector<64x1xf32>
    %17 = vector.extract_strided_slice %0 {offsets = [2, 0], sizes = [1, 128], strides = [1, 1]} : vector<4x128xf32> to vector<1x128xf32>
    %18 = vector.broadcast %16 : vector<64x1xf32> to vector<64x128xf32>
    %19 = vector.broadcast %17 : vector<1x128xf32> to vector<64x128xf32>
    %20 = arith.mulf %18, %19 : vector<64x128xf32>
    %21 = arith.addf %15, %20 : vector<64x128xf32>
    %22 = vector.extract_strided_slice %1 {offsets = [0, 3], sizes = [64, 1], strides = [1, 1]} : vector<64x4xf32> to vector<64x1xf32>
    %23 = vector.extract_strided_slice %0 {offsets = [3, 0], sizes = [1, 128], strides = [1, 1]} : vector<4x128xf32> to vector<1x128xf32>
    %24 = vector.broadcast %22 : vector<64x1xf32> to vector<64x128xf32>
    %25 = vector.broadcast %23 : vector<1x128xf32> to vector<64x128xf32>
    %26 = arith.mulf %24, %25 : vector<64x128xf32>
    %27 = arith.addf %21, %26 : vector<64x128xf32>
    %cst = arith.constant 0.000000e+00 : f32
    %28 = vector.broadcast %cst : f32 to vector<64x128xf32>
    %29 = arith.maximumf %27, %28 : vector<64x128xf32>
    %c0_5 = arith.constant 0 : index
    %c0_6 = arith.constant 0 : index
    %30 = vector.load %arg4[%c0_5, %c0_6] : memref<64x1xf32, #tpu.memory_space<vmem>>, vector<64x1xf32>
    %31 = vector.broadcast %30 : vector<64x1xf32> to vector<64x128xf32>
    %32 = arith.mulf %29, %31 : vector<64x128xf32>
    %cst_7 = arith.constant dense<0.000000e+00> : vector<128xf32>
    %33 = vector.multi_reduction <add>, %32, %cst_7 [0] : vector<64x128xf32> to vector<128xf32>
    %34 = vector.shape_cast %33 : vector<128xf32> to vector<1x128xf32>
    %c0_8 = arith.constant 0 : index
    %c0_9 = arith.constant 0 : index
    %35 = vector.load %arg5[%c0_8, %c0_9] : memref<1x1xf32, #tpu.memory_space<vmem>>, vector<1x1xf32>
    %36 = vector.broadcast %35 : vector<1x1xf32> to vector<1x128xf32>
    %37 = arith.addf %34, %36 : vector<1x128xf32>
    %c0_10 = arith.constant 0 : index
    %c0_11 = arith.constant 0 : index
    %38 = vector.load %arg6[%c0_10, %c0_11] : memref<1x128xf32, #tpu.memory_space<vmem>>, vector<1x128xf32>
    tpu.vector_store %arg6[%c0_10, %c0_11], %37 {strides = array<i32>} : memref<1x128xf32, #tpu.memory_space<vmem>>, vector<1x128xf32>,
    return
  }
  func.func @transform_0(%arg0: i32) -> (i32, i32) {
    %c0_i32 = arith.constant 0 : i32
    %c0_i32_0 = arith.constant 0 : i32
    return %c0_i32, %arg0 : i32, i32
  }
  func.func @transform_1(%arg0: i32) -> (i32, i32) {
    %c0_i32 = arith.constant 0 : i32
    %c0_i32_0 = arith.constant 0 : i32
    %c0_i32_1 = arith.constant 0 : i32
    return %c0_i32, %c0_i32_0 : i32, i32
  }
  func.func @transform_2(%arg0: i32) -> (i32, i32) {
    %c0_i32 = arith.constant 0 : i32
    %c0_i32_0 = arith.constant 0 : i32
    %c0_i32_1 = arith.constant 0 : i32
    return %c0_i32, %c0_i32_0 : i32, i32
  }
  func.func @transform_3(%arg0: i32) -> (i32, i32) {
    %c0_i32 = arith.constant 0 : i32
    %c0_i32_0 = arith.constant 0 : i32
    %c0_i32_1 = arith.constant 0 : i32
    return %c0_i32, %c0_i32_0 : i32, i32
  }
  func.func @transform_4(%arg0: i32) -> (i32, i32) {
    %c0_i32 = arith.constant 0 : i32
    %c0_i32_0 = arith.constant 0 : i32
    %c0_i32_1 = arith.constant 0 : i32
    return %c0_i32, %c0_i32_0 : i32, i32
  }
  func.func @transform_5(%arg0: i32) -> (i32, i32) {
    %c0_i32 = arith.constant 0 : i32
    %c0_i32_0 = arith.constant 0 : i32
    return %c0_i32, %arg0 : i32, i32
  }
}

</mosaic_0001>

<bundles_post_ra>
// kernel: tpu_custom_call.1
= control target key start
LH: loop header
LB: loop body
LE: loop exit
PB: predicated region body
PF: predicated region fallthrough
CT: control target
= control target key end

     0   :  { %s663_s0 = inlined_call_operand.vmem [shape: f32[4,128], index: 0, kind: input, shape index: {}]   ;;  %s664_s1 = inlined_call_operand.vmem [shape: f32[64,4], index: 1, kind: input, shape index: {}]   ;;  %s665_s2 = inlined_call_operand.vmem [shape: f32[64,1], index: 2, kind: input, shape index: {}]   ;;  %s666_s3 = inlined_call_operand.vmem [shape: f32[64,1], index: 3, kind: input, shape index: {}]   ;;  %s667_s4 = inlined_call_operand.<no memory space> [shape: f32[1,1], index: 4, kind: input, shape index: {}]   ;;  %s668_s5 = inlined_call_operand.hbm [shape: f32[1,128], index: 5, kind: output, shape index: {}]  }
   0x1   :  { %v10_v0 = vstv %s667_s4 }
   0x2   :  { %11 = vst [vmem:[#allocation2] sm:$0x1] %v10_v0 }
   0x3   :  { %v26_v1 = vld [vmem:[%s664_s1 + $0x10] sm:$0xff]  ;;  %v24_v2 = vld [vmem:[%s664_s1] sm:$0xff]  ;;  %v444_v3 = vmov 1   ;;  %v445_v4 = vmov 0   ;;  %v27_v5 = vld [vmem:[%s664_s1 + $0x18] sm:$0xff] }
   0x4   :  { %405 = vset.pattern.permute.xlu0 %v444_v3  ;;  %404 = vset.pattern.permute.xlu1 %v445_v4  ;;  %v29_v6 = vld [vmem:[%s664_s1 + $0x28] sm:$0xff] }
   0x5   :  { %52 = vperm.xlu1 %404, %v26_v1   ;;  %141 = vperm.xlu0 %405, %v24_v2  }
   0x9   :  { %57 = vperm.xlu1 %404, %v27_v5   ;;  %153 = vperm.xlu0 %405, %v27_v5  }
   0xa   :  { %12 = vsyncpa [#allocation4], 0  ;;  %v499_v7 = vld [vmem:[%s664_s1 + $0x38] sm:$0xff]  ;;  %v446_v8 = vmov 2   ;;  %v33_v9 = vld [vmem:[%s665_s2 + $0x8] sm:$0xff]  ;;  %v447_v21 = vmov 3   ;;  %v80_v34 = vlaneseq }
   0xb   :  { %v35_v10 = vld [vmem:[%s665_s2 + $0x18] sm:$0xff]  ;;  %v25_v11 = vld [vmem:[%s664_s1 + $0x8] sm:$0xff]  ;;  %v28_v13 = vld [vmem:[%s664_s1 + $0x20] sm:$0xff] }
   0xc   :  { %v37_v12 = vld [vmem:[%s665_s2 + $0x28] sm:$0xff]  ;;  %v39_v14 = vld [vmem:[%s665_s2 + $0x38] sm:$0xff]  ;;  %v30_v15 = vld [vmem:[%s664_s1 + $0x30] sm:$0xff]  ;;  %v578_v37 = vshrl.u32 %v80_v34, 7 }
   0xd   :  { %67 = vperm.xlu1 %404, %v29_v6   ;;  %161 = vperm.xlu0 %405, %v29_v6   ;;  %v32_v16 = vld [vmem:[%s665_s2] sm:$0xff]  ;;  %v34_v17 = vld [vmem:[%s665_s2 + $0x10] sm:$0xff]  ;;  %v305_v20 = vld [vmem:[%s666_s3 + $0x8] sm:$0xff] }
   0xe   :  { %v36_v18 = vld [vmem:[%s665_s2 + $0x20] sm:$0xff]  ;;  %v38_v19 = vld [vmem:[%s665_s2 + $0x30] sm:$0xff]  ;;  %v309_v23 = vld [vmem:[%s666_s3 + $0x28] sm:$0xff]  ;;  %v82_v39 = vsub.s32 0, %v578_v37 }
   0xf   :  { %v304_v22 = vld [vmem:[%s666_s3] sm:$0xff]  ;;  %v306_v25 = vld [vmem:[%s666_s3 + $0x10] sm:$0xff]  ;;  %v307_v26 = vld [vmem:[%s666_s3 + $0x18] sm:$0xff] }
  0x10   :  { %v373_v24 = vld [vmem:[#allocation2] sm:$0x1]  ;;  %v310_v28 = vld [vmem:[%s666_s3 + $0x30] sm:$0xff]  ;;  %v311_v29 = vld [vmem:[%s666_s3 + $0x38] sm:$0xff] }
  0x11   :  { %77 = vperm.xlu1 %404, %v499_v7   ;;  %407 = vset.pattern.permute.xlu0 %v446_v8  ;;  %v308_v27 = vld [vmem:[%s666_s3 + $0x20] sm:$0xff] }
  0x12   :  { %193 = vperm.xlu0 %407, %v24_v2   ;;  %v23_v41 = vld [vmem:[%s663_s0] sm:$0xf]  ;;  %s448_s0 = smov [#allocation3]  }
  0x13   :  { %v586_v43 = vrot.slane %v23_v41, %v82_v39  ;;  %s391_s3 = sshll.u32 %s448_s0, 4  ;;  %s392_s3 = int_to_ptr.vmem [resolvable:$true] %s391_s3 }
  0x14   :  { %s420_s16 = scalar_lea.vmem %s392_s3, 16  ;;  %s424_s17 = scalar_lea.vmem %s392_s3, 32 }
  0x15   :  { %99 = vperm.xlu1 %404, %v33_v9   ;;  %v226_v9 = vsub.s32 2, %v578_v37  ;;  %p421_p0 = scmp.ne.s32.totalorder %s392_s3, %s420_s16  ;;  %p425_p1 = scmp.lt.s32.totalorder %s392_s3, %s392_s3 }
  0x16   :  { %408 = vset.pattern.permute.xlu0 %v445_v4  ;;  %p426_p2 = scmp.lt.s32.totalorder %s424_s17, %s420_s16 }
  0x17   :  { %42 = vperm.xlu0 %408, %v24_v2  }
  0x18   :  { %p427_p3 = por %p426_p2, %p425_p1 }
  0x19   :  { %109 = vperm.xlu1 %404, %v35_v10  }
  0x1a   :  { %p428_p4 = pnand %p427_p3, %p421_p0 }
  0x1b   :  { %47 = vperm.xlu0 %408, %v25_v11  }
  0x1d   :  { %119 = vperm.xlu1 %404, %v37_v12   ;;  %v278_v12 = vsub.s32 3, %v578_v37 }
  0x1f   :  { %62 = vperm.xlu0 %408, %v28_v13  }
  0x21   :  { %129 = vperm.xlu1 %404, %v39_v14  }
  0x23   :  { %72 = vperm.xlu0 %408, %v30_v15  }
  0x25   :  { %406 = vset.pattern.permute.xlu1 %v444_v3 }
  0x26   :  { %145 = vperm.xlu1 %406, %v25_v11  }
  0x27   :  { %94 = vperm.xlu0 %408, %v32_v16   ;;  %v610_v16 = vrot.slane %v23_v41, %v226_v9 }
  0x2a   :  { %149 = vperm.xlu1 %406, %v26_v1  }
  0x2b   :  { %104 = vperm.xlu0 %408, %v34_v17  }
  0x2e   :  { %157 = vperm.xlu1 %406, %v28_v13  }
  0x2f   :  { %114 = vperm.xlu0 %408, %v36_v18  }
  0x32   :  { %165 = vperm.xlu1 %406, %v30_v15  }
  0x33   :  { %124 = vperm.xlu0 %408, %v38_v19  }
  0x36   :  { %409 = vset.pattern.permute.xlu1 %v446_v8 }
  0x37   :  { %197 = vperm.xlu1 %409, %v25_v11   ;;  %319 = vperm.xlu0 %408, %v305_v20   ;;  %v614_v20 = vrot.slane %v23_v41, %v278_v12 }
  0x3b   :  { %201 = vperm.xlu1 %409, %v26_v1   ;;  %413 = vset.pattern.permute.xlu0 %v447_v21 }
  0x3c   :  { %245 = vperm.xlu0 %413, %v24_v2  }
  0x3f   :  { %410 = vset.pattern.permute.xlu1 %v447_v21 }
  0x40   :  { %249 = vperm.xlu1 %410, %v25_v11   ;;  %253 = vperm.xlu0 %413, %v26_v1  }
  0x44   :  { %411 = vset.pattern.permute.xlu1 %v446_v8  ;;  %257 = vperm.xlu0 %413, %v27_v5  }
  0x45   :  { %205 = vperm.xlu1 %411, %v27_v5  }
  0x48   :  { %261 = vperm.xlu0 %413, %v28_v13  }
  0x49   :  { %209 = vperm.xlu1 %411, %v28_v13  }
  0x4c   :  { %265 = vperm.xlu0 %413, %v29_v6  }
  0x4d   :  { %213 = vperm.xlu1 %411, %v29_v6  }
  0x50   :  { %269 = vperm.xlu0 %413, %v30_v15  }
  0x51   :  { %412 = vset.pattern.permute.xlu1 %v445_v4 }
  0x52   :  { %314 = vperm.xlu1 %412, %v304_v22  }
  0x54   :  { %273 = vperm.xlu0 %413, %v499_v7  }
  0x56   :  { %414 = vset.pattern.permute.xlu1 %v444_v3 }
  0x57   :  { %169 = vperm.xlu1 %414, %v499_v7  }
  0x58   :  { %419 = vset.pattern.permute.xlu0 %v445_v4 }
  0x59   :  { %339 = vperm.xlu0 %419, %v309_v23  }
  0x5b   :  { %415 = vset.pattern.permute.xlu1 %v446_v8 }
  0x5c   :  { %217 = vperm.xlu1 %415, %v30_v15  }
  0x5d   :  { %376 = vperm.xlu0 %419, %v373_v24  }
  0x60   :  { %416 = vset.pattern.permute.xlu1 %v445_v4 }
  0x61   :  { %324 = vperm.xlu1 %416, %v306_v25  }
  0x65   :  { %417 = vset.pattern.permute.xlu1 %v446_v8 }
  0x66   :  { %221 = vperm.xlu1 %417, %v499_v7   ;;  %v174_v7 = vsub.s32 1, %v578_v37 }
  0x68   :  { %v607_v13 = vrot.slane %v23_v41, %v174_v7 }
  0x6a   :  { %418 = vset.pattern.permute.xlu1 %v445_v4 }
  0x6b   :  { %329 = vperm.xlu1 %418, %v307_v26  }
  0x6f   :  { %334 = vperm.xlu1 %418, %v308_v27  }
  0x73   :  { %344 = vperm.xlu1 %418, %v310_v28  }
  0x77   :  { %349 = vperm.xlu1 %418, %v311_v29  }
  0x84   :  { %v53_v30 = vpop.permute.xlu1 %52  ;;  %v142_v31 = vpop.permute.xlu0 %141 }
  0x85   :  { %v176_v19 = vmul.f32 %v607_v13, %v142_v31  ;;  %v86_v23 = vmul.f32 %v586_v43, %v53_v30 }
  0x88   :  { %v58_v32 = vpop.permute.xlu1 %57  ;;  %v574_v33 = vpop.permute.xlu0 %153 }
  0x89   :  { %v87_v45 = vmul.f32 %v586_v43, %v58_v32 }
  0x8c   :  { %v68_v35 = vpop.permute.xlu1 %67  ;;  %v576_v36 = vpop.permute.xlu0 %161 }
  0x8d   :  { %v89_v49 = vmul.f32 %v586_v43, %v68_v35 }
  0x90   :  { %v78_v38 = vpop.permute.xlu1 %77 }
  0x91   :  { %v194_v40 = vpop.permute.xlu0 %193  ;;  %v91_v53 = vmul.f32 %v586_v43, %v78_v38 }
  0x92   :  { %v228_v24 = vmul.f32 %v610_v16, %v194_v40 }
  0x94   :  { %v100_v42 = vpop.permute.xlu1 %99 }
  0x96   :  { %v43_v44 = vpop.permute.xlu0 %42 }
  0x97   :  { %v84_v10 = vmul.f32 %v586_v43, %v43_v44 }
  0x98   :  { %v110_v46 = vpop.permute.xlu1 %109 }
  0x99   :  { %v589_v47 = vadd.f32 %v110_v46, %v87_v45 }
  0x9a   :  { %v48_v48 = vpop.permute.xlu0 %47 }
  0x9b   :  { %v85_v14 = vmul.f32 %v586_v43, %v48_v48 }
  0x9c   :  { %v120_v50 = vpop.permute.xlu1 %119 }
  0x9d   :  { %v592_v51 = vadd.f32 %v120_v50, %v89_v49  ;;  %v133_v21 = vadd.f32 %v100_v42, %v85_v14  ;;  %v179_v50 = vmul.f32 %v607_v13, %v574_v33  ;;  %v181_v33 = vmul.f32 %v607_v13, %v576_v36 }
  0x9e   :  { %v63_v52 = vpop.permute.xlu0 %62 }
  0x9f   :  { %v88_v49 = vmul.f32 %v586_v43, %v63_v52  ;;  %v189_v36 = vadd.f32 %v181_v33, %v592_v51 }
  0xa0   :  { %v130_v54 = vpop.permute.xlu1 %129 }
  0xa1   :  { %v595_v55 = vadd.f32 %v130_v54, %v91_v53 }
  0xa2   :  { %v597_v56 = vpop.permute.xlu0 %72 }
  0xa3   :  { %v90_v7 = vmul.f32 %v586_v43, %v597_v56 }
  0xa5   :  { %v146_v57 = vpop.permute.xlu1 %145 }
  0xa6   :  { %v95_v58 = vpop.permute.xlu0 %94  ;;  %v177_v18 = vmul.f32 %v607_v13, %v146_v57 }
  0xa7   :  { %v132_v17 = vadd.f32 %v95_v58, %v84_v10 }
  0xa8   :  { %v185_v28 = vadd.f32 %v177_v18, %v133_v21 }
  0xa9   :  { %v150_v59 = vpop.permute.xlu1 %149  ;;  %v184_v25 = vadd.f32 %v176_v19, %v132_v17 }
  0xaa   :  { %v105_v60 = vpop.permute.xlu0 %104  ;;  %v178_v29 = vmul.f32 %v607_v13, %v150_v59 }
  0xab   :  { %v134_v32 = vadd.f32 %v105_v60, %v86_v23  ;;  %v236_v41 = vadd.f32 %v228_v24, %v184_v25 }
  0xad   :  { %v158_v61 = vpop.permute.xlu1 %157  ;;  %v186_v44 = vadd.f32 %v178_v29, %v134_v32 }
  0xae   :  { %v115_v63 = vpop.permute.xlu0 %114 }
  0xb1   :  { %v599_v62 = vpop.permute.xlu1 %165 }
  0xb2   :  { %v601_v1 = vpop.permute.xlu0 %124 }
  0xb3   :  { %v138_v43 = vadd.f32 %v601_v1, %v90_v7 }
  0xb6   :  { %v198_v0 = vpop.permute.xlu1 %197  ;;  %v320_v3 = vpop.permute.xlu0 %319 }
  0xb7   :  { %v229_v26 = vmul.f32 %v610_v16, %v198_v0 }
  0xb9   :  { %v237_v35 = vadd.f32 %v229_v26, %v185_v28 }
  0xba   :  { %v202_v2 = vpop.permute.xlu1 %201 }
  0xbb   :  { %v246_v5 = vpop.permute.xlu0 %245  ;;  %v230_v38 = vmul.f32 %v610_v16, %v202_v2  ;;  %v180_v2 = vmul.f32 %v607_v13, %v158_v61 }
  0xbc   :  { %v280_v34 = vmul.f32 %v614_v20, %v246_v5  ;;  %v187_v5 = vadd.f32 %v179_v50, %v589_v47  ;;  %v182_v47 = vmul.f32 %v607_v13, %v599_v62 }
  0xbd   :  { %v238_v48 = vadd.f32 %v230_v38, %v186_v44 }
  0xbe   :  { %v288_v40 = vadd.f32 %v280_v34, %v236_v41  ;;  %v190_v23 = vadd.f32 %v182_v47, %v138_v43 }
  0xbf   :  { %v250_v4 = vpop.permute.xlu1 %249  ;;  %v254_v11 = vpop.permute.xlu0 %253 }
  0xc0   :  { %v281_v31 = vmul.f32 %v614_v20, %v250_v4  ;;  %v282_v46 = vmul.f32 %v614_v20, %v254_v11  ;;  %v296_v57 = vmax.f32 %v288_v40, 0.0  ;;  %v136_v4 = vadd.f32 %v115_v63, %v88_v49 }
  0xc2   :  { %v289_v45 = vadd.f32 %v281_v31, %v237_v35  ;;  %v290_v54 = vadd.f32 %v282_v46, %v238_v48  ;;  %v188_v61 = vadd.f32 %v180_v2, %v136_v4 }
  0xc3   :  { %v258_v22 = vpop.permute.xlu0 %257 }
  0xc4   :  { %v206_v6 = vpop.permute.xlu1 %205  ;;  %v297_v53 = vmax.f32 %v289_v45, 0.0  ;;  %v298_v9 = vmax.f32 %v290_v54, 0.0  ;;  %v283_v10 = vmul.f32 %v614_v20, %v258_v22 }
  0xc5   :  { %v231_v60 = vmul.f32 %v610_v16, %v206_v6 }
  0xc6   :  { %v353_v52 = vmul.f32 %v320_v3, %v297_v53 }
  0xc7   :  { %v262_v42 = vpop.permute.xlu0 %261  ;;  %v239_v12 = vadd.f32 %v231_v60, %v187_v5 }
  0xc8   :  { %v210_v8 = vpop.permute.xlu1 %209  ;;  %v284_v21 = vmul.f32 %v614_v20, %v262_v42 }
  0xc9   :  { %v232_v6 = vmul.f32 %v610_v16, %v210_v8  ;;  %v291_v18 = vadd.f32 %v283_v10, %v239_v12 }
  0xcb   :  { %v266_v59 = vpop.permute.xlu0 %265  ;;  %v240_v19 = vadd.f32 %v232_v6, %v188_v61  ;;  %v299_v28 = vmax.f32 %v291_v18, 0.0 }
  0xcc   :  { %v214_v15 = vpop.permute.xlu1 %213  ;;  %v285_v25 = vmul.f32 %v614_v20, %v266_v59 }
  0xcd   :  { %v233_v56 = vmul.f32 %v610_v16, %v214_v15  ;;  %v292_v1 = vadd.f32 %v284_v21, %v240_v19 }
  0xcf   :  { %v270_v63 = vpop.permute.xlu0 %269  ;;  %v241_v24 = vadd.f32 %v233_v56, %v189_v36  ;;  %v300_v41 = vmax.f32 %v292_v1, 0.0 }
  0xd0   :  { %v286_v32 = vmul.f32 %v614_v20, %v270_v63 }
  0xd1   :  { %v315_v27 = vpop.permute.xlu1 %314  ;;  %v293_v29 = vadd.f32 %v285_v25, %v241_v24 }
  0xd2   :  { %v352_v0 = vmul.f32 %v315_v27, %v296_v57 }
  0xd3   :  { %v274_v26 = vpop.permute.xlu0 %273 }
  0xd4   :  { %v360_v14 = vadd.f32 %v353_v52, %v352_v0 }
  0xd6   :  { %v170_v30 = vpop.permute.xlu1 %169 }
  0xd7   :  { %v183_v62 = vmul.f32 %v607_v13, %v170_v30  ;;  %v287_v13 = vmul.f32 %v614_v20, %v274_v26  ;;  %v301_v30 = vmax.f32 %v293_v29, 0.0 }
  0xd8   :  { %v340_v44 = vpop.permute.xlu0 %339 }
  0xd9   :  { %v191_v34 = vadd.f32 %v183_v62, %v595_v55  ;;  %v357_v46 = vmul.f32 %v340_v44, %v301_v30 }
  0xdb   :  { %v218_v58 = vpop.permute.xlu1 %217 }
  0xdc   :  { %v234_v8 = vmul.f32 %v610_v16, %v218_v58  ;;  %v377_v7 = vpop.permute.xlu0 %376 }
  0xdd   :  { %v382_v52 = vrot.slane %v377_v7, %v82_v39 }
  0xde   :  { %v242_v27 = vadd.f32 %v234_v8, %v190_v23 }
  0xe0   :  { %v325_v11 = vpop.permute.xlu1 %324  ;;  %v294_v42 = vadd.f32 %v286_v32, %v242_v27 }
  0xe1   :  { %v354_v17 = vmul.f32 %v325_v11, %v298_v9 }
  0xe2   :  { %v302_v48 = vmax.f32 %v294_v42, 0.0 }
  0xe3   :  { %v361_v3 = vadd.f32 %v360_v14, %v354_v17 }
  0xe5   :  { %v222_v22 = vpop.permute.xlu1 %221 }
  0xe6   :  { %v235_v15 = vmul.f32 %v610_v16, %v222_v22 }
  0xe8   :  { %v243_v35 = vadd.f32 %v235_v15, %v191_v34 }
  0xea   :  { %v330_v51 = vpop.permute.xlu1 %329  ;;  %v295_v49 = vadd.f32 %v287_v13, %v243_v35 }
  0xeb   :  { %v355_v31 = vmul.f32 %v330_v51, %v299_v28 }
  0xec   :  { %v303_v57 = vmax.f32 %v295_v49, 0.0 }
  0xed   :  { %v362_v38 = vadd.f32 %v361_v3, %v355_v31 }
  0xee   :  { %v335_v40 = vpop.permute.xlu1 %334 }
  0xef   :  { %v356_v45 = vmul.f32 %v335_v40, %v300_v41 }
  0xf1   :  { %v363_v16 = vadd.f32 %v362_v38, %v356_v45 }
  0xf2   :  { %v345_v50 = vpop.permute.xlu1 %344 }
  0xf3   :  { %v358_v53 = vmul.f32 %v345_v50, %v302_v48  ;;  %v364_v54 = vadd.f32 %v363_v16, %v357_v46 }
  0xf5   :  { %v365_v58 = vadd.f32 %v364_v54, %v358_v53 }
  0xf6   :  { %v350_v55 = vpop.permute.xlu1 %349 }
  0xf7   :  { %v359_v59 = vmul.f32 %v350_v55, %v303_v57 }
  0xf9   :  { %v366_v60 = vadd.f32 %v365_v58, %v359_v59 }
  0xfb   :  { %v367_v0 = vrot.slane %v366_v60, 4 }
  0xfd   :  { %v368_v2 = vadd.f32 %v367_v0, %v366_v60 }
  0xff   :  { %v369_v4 = vrot.slane %v368_v2, 2 }
 0x101   :  { %v370_v5 = vadd.f32 %v369_v4, %v368_v2 }
 0x103   :  { %v371_v20 = vrot.slane %v370_v5, 1 }
 0x105   :  { %v372_v9 = vadd.f32 %v371_v20, %v370_v5 }
 0x107   :  { %v383_v33 = vadd.f32 %v382_v52, %v372_v9 }
 0x109   :  { %384 = vst [vmem:[#allocation3] sm:$0x1] %v383_v33 }
 0x10a   :  { %431 = shalt.err (!%p428_p4)
}
 0x10b   :  { %s432_s20 = scalar_lea.hbm %s668_s5, 16 }
 0x10c   :  { %p433_p5 = scmp.ne.s32.totalorder %s668_s5, %s432_s20  ;;  %p436_p6 = scmp.lt.u32.totalorder %s432_s20, %s668_s5 }
 0x10e   :  { %p438_p7 = pnand %p436_p6, %p433_p5 }
 0x110   :  { %441 = shalt.err (!%p438_p7)
}
 0x111   :  { %394 = dma.vmem_to_hbm [thread:$0]  %s392_s3, 16, %s668_s5, [#allocation4]  }
 0x112   :  { %442 = dma.done.wait [#allocation4], 16  }
 0x113   :  { %443 = vsyncadd [#allocation4], 4294967280 }
 0x114   :  { %398 = vsyncpa [#allocation4], 1 }

</bundles_post_ra>
